<compile_context>
chip_gen: v5e
topology: v5e:2x2
jax: 0.10.0
libtpu: 0.0.40
codegen_flags: <defaults>
</compile_context>

<pallas_src>
import functools
import math

import jax
import jax.numpy as jnp
from jax.experimental import pallas as pl
from jax.experimental.pallas import tpu as pltpu

EPS = 1e-8


def _round_up(x: int, m: int) -> int:
    return ((x + m - 1) // m) * m


def _sublane_multiple(dtype) -> int:
    # f32 packs 8 rows / vreg, bf16 16, int8/fp8 32.
    itemsize = jnp.dtype(dtype).itemsize
    return {4: 8, 2: 16, 1: 32}.get(itemsize, 8)


def _target_block_bytes() -> int:
    # v7x HBM is ~3.2 TB/s per TC: a 4 MiB tile is only ~2.5 us, so the fixed
    # ~0.35 us/step pipeline overhead is ~12%.  Use ~8 MiB tiles there (still
    # well inside its 64 MiB physical VMEM); 4 MiB elsewhere (v5e/v6e measured
    # ~85% of roofline at 512x2048 f32 -- bigger tiles buy ~1%).
    try:
        kind = jax.devices()[0].device_kind.lower()
    except Exception:  # pragma: no cover - defensive
        kind = ""
    return (8 << 20) if "v7" in kind else (4 << 20)


def _norm_kernel(x_ref, mean_ref, std_ref, o_ref, *, eps):
    # x_ref:    (tm, tn) tile of the input
    # mean_ref: (1,  tn) per-feature mean  (float32)
    # std_ref:  (1,  tn) per-feature std   (float32)
    x = x_ref[...].astype(jnp.float32)
    mean = mean_ref[...]
    # Exact reciprocal once per (1, tn) slab, then broadcast-multiply.
    # (Kernel is HBM-bound; approx recip would only risk the 1e-6 tolerance.)
    inv = 1.0 / (std_ref[...] + eps)
    o_ref[...] = ((x - mean) * inv).astype(o_ref.dtype)


def norm_layer(x, mean, std, *, eps=EPS, tm=None, tn=None, block_bytes=None):
    """Apply (x - mean) / (std + eps); mean/std broadcast over leading dims."""
    orig_shape = x.shape
    D = orig_shape[-1]
    B = math.prod(orig_shape[:-1]) if len(orig_shape) > 1 else 1
    x2 = x.reshape(B, D)

    itemsize = jnp.dtype(x2.dtype).itemsize
    row_mult = _sublane_multiple(x2.dtype)
    if block_bytes is None:
        block_bytes = _target_block_bytes()

    # ---- tile selection (lane-dense, dtype- and shape-aware) ----
    if tn is None:
        tn = 2048
    tn_eff = max(128, min(_round_up(tn, 128), _round_up(D, 128)))
    if tm is None:
        tm = max(1, block_bytes // (tn_eff * itemsize))  # ~block_bytes payload
    tm_eff = max(row_mult, min(_round_up(tm, row_mult), _round_up(B, row_mult)))

    grid_d = pl.cdiv(D, tn_eff)   # features (outer -> stats stay resident)
    grid_b = pl.cdiv(B, tm_eff)   # batch    (inner)

    # ---- statistics: float32, padded only up to the feature-tile extent ----
    Dp = grid_d * tn_eff  # < D + tn_eff; padding the (D,) vectors is ~free
    mean1d = jnp.broadcast_to(jnp.ravel(jnp.asarray(mean, jnp.float32)), (D,))
    std1d = jnp.broadcast_to(jnp.ravel(jnp.asarray(std, jnp.float32)), (D,))
    mean2d = jnp.pad(mean1d, (0, Dp - D)).reshape(1, Dp)
    # Pad std with 1.0 so the (masked-out) padded lanes stay finite.
    std2d = jnp.pad(std1d, (0, Dp - D), constant_values=1.0).reshape(1, Dp)

    # ---- VMEM budget: double-buffered x + out blocks, plus the stat slabs ----
    xo_block = tm_eff * tn_eff * itemsize
    stat_block = 8 * tn_eff * 4  # (1, tn) f32, sublane-padded to 8 rows
    vmem_needed = 2 * (2 * xo_block) + 2 * 2 * stat_block
    vmem_limit = int(vmem_needed + (4 << 20))  # headroom; > v5e's 16 MiB default

    cost = pl.CostEstimate(
        flops=3 * B * D,
        transcendentals=0,
        bytes_accessed=2 * B * D * itemsize + 2 * Dp * 4,
    )

    out = pl.pallas_call(
        functools.partial(_norm_kernel, eps=eps),
        out_shape=jax.ShapeDtypeStruct((B, D), x2.dtype),
        grid_spec=pltpu.PrefetchScalarGridSpec(
            num_scalar_prefetch=0,
            grid=(grid_d, grid_b),
            in_specs=[
                pl.BlockSpec((tm_eff, tn_eff), lambda d, b: (b, d)),  # x
                pl.BlockSpec((1, tn_eff), lambda d, b: (0, d)),       # mean
                pl.BlockSpec((1, tn_eff), lambda d, b: (0, d)),       # std
            ],
            out_specs=pl.BlockSpec((tm_eff, tn_eff), lambda d, b: (b, d)),
        ),
        compiler_params=pltpu.CompilerParams(
            dimension_semantics=("parallel", "parallel"),
            vmem_limit_bytes=vmem_limit,
        ),
        cost_estimate=cost,
    )(x2, mean2d, std2d)

    return out.reshape(orig_shape)


if __name__ == "__main__":
    key = jax.random.PRNGKey(0)
    kx, km, ks, kx2 = jax.random.split(key, 4)

    # --- case 1: aligned small shape (features on the 128-lane axis) ---
    B, D = 8, 128
    x = jax.random.normal(kx, (B, D), dtype=jnp.float32)
    mean = jax.random.normal(km, (D,), dtype=jnp.float32)
    std = jax.random.uniform(ks, (D,), dtype=jnp.float32, minval=0.5, maxval=2.0)

    out = norm_layer(x, mean, std)
    jax.block_until_ready(out)

    ref = (x - mean[None, :]) / (std[None, :] + EPS)
    assert out.shape == ref.shape
    assert jnp.allclose(out, ref, atol=1e-6, rtol=1e-6)

    # --- case 2: ragged small shape (exercises cdiv-grid edge clipping,
    #             no wrapper-side padding of x or slicing of the output) ---
    B2, D2 = 10, 200
    x2 = jax.random.normal(kx2, (B2, D2), dtype=jnp.float32)
    mean2 = jnp.linspace(-1.0, 1.0, D2, dtype=jnp.float32)
    std2 = jnp.linspace(0.5, 2.0, D2, dtype=jnp.float32)

    out2 = norm_layer(x2, mean2, std2)
    jax.block_until_ready(out2)

    ref2 = (x2 - mean2[None, :]) / (std2[None, :] + EPS)
    assert out2.shape == (B2, D2)
    assert jnp.allclose(out2, ref2, atol=1e-6, rtol=1e-6)

    print("KERNEL_OK")
</pallas_src>

<mosaic_0001>
module attributes {stable_mosaic.version = 11 : i64} {
  func.func @_norm_kernel(%arg0: i32, %arg1: i32, %arg2: memref<8x128xf32, #tpu.memory_space<vmem>>, %arg3: memref<1x128xf32, #tpu.memory_space<vmem>>, %arg4: memref<1x128xf32, #tpu.memory_space<vmem>>, %arg5: memref<8x128xf32, #tpu.memory_space<vmem>>) attributes {dimension_semantics = [#tpu.dimension_semantics<parallel>, #tpu.dimension_semantics<parallel>], iteration_bounds = array<i64: 1, 1>, scalar_prefetch = 0 : i64, scratch_operands = 0 : i64, tpu.core_type = #tpu.core_type<tc>, window_params = [{transform_indices = @transform_0, window_bounds = array<i64: 8, 128>}, {transform_indices = @transform_1, window_bounds = array<i64: 1, 128>}, {transform_indices = @transform_2, window_bounds = array<i64: 1, 128>}, {transform_indices = @transform_3, window_bounds = array<i64: 8, 128>}]} {
    %c0 = arith.constant 0 : index
    %c0_0 = arith.constant 0 : index
    %0 = vector.load %arg2[%c0, %c0_0] : memref<8x128xf32, #tpu.memory_space<vmem>>, vector<8x128xf32>
    %c0_1 = arith.constant 0 : index
    %c0_2 = arith.constant 0 : index
    %1 = vector.load %arg3[%c0_1, %c0_2] : memref<1x128xf32, #tpu.memory_space<vmem>>, vector<1x128xf32>
    %c0_3 = arith.constant 0 : index
    %c0_4 = arith.constant 0 : index
    %2 = vector.load %arg4[%c0_3, %c0_4] : memref<1x128xf32, #tpu.memory_space<vmem>>, vector<1x128xf32>
    %cst = arith.constant 9.99999993E-9 : f32
    %3 = vector.broadcast %cst : f32 to vector<1x128xf32>
    %4 = arith.addf %2, %3 : vector<1x128xf32>
    %cst_5 = arith.constant 1.000000e+00 : f32
    %5 = vector.broadcast %cst_5 : f32 to vector<1x128xf32>
    %6 = arith.divf %5, %4 : vector<1x128xf32>
    %7 = vector.broadcast %1 : vector<1x128xf32> to vector<8x128xf32>
    %8 = arith.subf %0, %7 : vector<8x128xf32>
    %9 = vector.broadcast %6 : vector<1x128xf32> to vector<8x128xf32>
    %10 = arith.mulf %8, %9 : vector<8x128xf32>
    %c0_6 = arith.constant 0 : index
    %c0_7 = arith.constant 0 : index
    %11 = vector.load %arg5[%c0_6, %c0_7] : memref<8x128xf32, #tpu.memory_space<vmem>>, vector<8x128xf32>
    tpu.vector_store %arg5[%c0_6, %c0_7], %10 {strides = array<i32>} : memref<8x128xf32, #tpu.memory_space<vmem>>, vector<8x128xf32>,
    return
  }
  func.func @transform_0(%arg0: i32, %arg1: i32) -> (i32, i32) {
    %c0_i32 = arith.constant 0 : i32
    return %arg1, %arg0 : i32, i32
  }
  func.func @transform_1(%arg0: i32, %arg1: i32) -> (i32, i32) {
    %c0_i32 = arith.constant 0 : i32
    %c0_i32_0 = arith.constant 0 : i32
    return %c0_i32, %arg0 : i32, i32
  }
  func.func @transform_2(%arg0: i32, %arg1: i32) -> (i32, i32) {
    %c0_i32 = arith.constant 0 : i32
    %c0_i32_0 = arith.constant 0 : i32
    return %c0_i32, %arg0 : i32, i32
  }
  func.func @transform_3(%arg0: i32, %arg1: i32) -> (i32, i32) {
    %c0_i32 = arith.constant 0 : i32
    return %arg1, %arg0 : i32, i32
  }
}

</mosaic_0001>

<bundles_post_ra>
// kernel: tpu_custom_call.1
= control target key start
LH: loop header
LB: loop body
LE: loop exit
PB: predicated region body
PF: predicated region fallthrough
CT: control target
= control target key end

     0   :  { %8 = vsyncpa [#allocation3], 0  ;;  %s208_s0 = inlined_call_operand.hbm [shape: f32[8,128], index: 0, kind: input, shape index: {}]   ;;  %s209_s1 = inlined_call_operand.hbm [shape: f32[1,128], index: 1, kind: input, shape index: {}]   ;;  %s210_s2 = inlined_call_operand.vmem [shape: f32[1,128], index: 2, kind: input, shape index: {}]   ;;  %s211_s3 = inlined_call_operand.hbm [shape: f32[8,128], index: 3, kind: output, shape index: {}]  }
   0x1   :  { %9 = vsyncpa [#allocation6], 0 }
   0x2   :  { %10 = vsyncpa [#allocation4], 0  ;;  %s16_s14 = sshll.u32 %s208_s0, 4  ;;  %s173_s15 = smov [#allocation2]   ;;  %s17_s14 = int_to_ptr.hbm [resolvable:$true] %s16_s14 }
   0x3   :  { %s18_s16 = sshll.u32 %s173_s15, 4  ;;  %s27_s19 = sshll.u32 %s209_s1, 4  ;;  %s19_s16 = int_to_ptr.vmem [resolvable:$true] %s18_s16  ;;  %s28_s19 = int_to_ptr.hbm [resolvable:$true] %s27_s19 }
   0x4   :  { %21 = dma.hbm_to_vmem [thread:$0]  %s17_s14, 128, %s19_s16, [#allocation3]  }
   0x5   :  { %s174_s20 = smov [#allocation5]  }
   0x6   :  { %s29_s21 = sshll.u32 %s174_s20, 4  ;;  %s30_s21 = int_to_ptr.vmem [resolvable:$true] %s29_s21 }
   0x7   :  { %32 = dma.hbm_to_vmem [thread:$0]  %s28_s19, 16, %s30_s21, [#allocation6]  }
   0x8   :  { %167 = dma.done.wait [#allocation3], 128  }
   0x9   :  { %168 = vsyncadd [#allocation3], 4294967168 }
   0xa   :  { %169 = dma.done.wait [#allocation6], 16  }
   0xb   :  { %170 = vsyncadd [#allocation6], 4294967280  ;;  %v45_v0 = vld [vmem:[%s210_s2] sm:$0x1]  ;;  %v92_v8 = vld [vmem:[#allocation5] ss:$0 sm:$0xff] }
   0xc   :  { %v46_v1 = vadd.f32 1e-08, %v45_v0  ;;  %v43_v9 = vld [vmem:[#allocation2] sm:$0xff]  ;;  %s175_s1 = smov [#allocation7]   ;;  %s78_s25 = sshll.u32 %s211_s3, 4  ;;  %s79_s25 = int_to_ptr.hbm [resolvable:$true] %s78_s25 }
   0xd   :  { %v65_v13 = vsub.f32 %v43_v9, %v92_v8  ;;  %s76_s2 = sshll.u32 %s175_s1, 4  ;;  %s77_s2 = int_to_ptr.vmem [resolvable:$true] %s76_s2 }
   0xe   :  { %93 = vrcp.f32 %v46_v1  ;;  %v58_v4 = vand.u32 2147483648, %v46_v1  ;;  %vm52_vm0 = vweird.f32 %v46_v1  ;;  %v56_v6 = vand.u32 2147483647, %v46_v1 }
  0x10   :  { %v59_v10 = vor.u32 1.1754944e-38, %v58_v4  ;;  %vm57_vm3 = vcmp.eq.f32.partialorder %v56_v6, 8.507059e+37 }
  0x14   :  { %v94_v2 = vpop.eup %93 }
  0x15   :  { %v48_v3 = vmul.f32 %v94_v2, %v46_v1  ;;  %vm53_vm1 = vweird.f32 %v94_v2 }
  0x16   :  { %vm54_vm2 = vmor %vm52_vm0, %vm53_vm1 }
  0x17   :  { %v49_v5 = vsub.f32 1.0, %v48_v3 }
  0x19   :  { %v50_v7 = vmul.f32 %v94_v2, %v49_v5 }
  0x1b   :  { %v51_v11 = vadd.f32 %v94_v2, %v50_v7 }
  0x1d   :  { %v55_v12 = vsel %vm54_vm2, %v94_v2, %v51_v11 }
  0x1e   :  { %v60_v14 = vsel %vm57_vm3, %v59_v10, %v55_v12 }
  0x1f   :  { %v67_v15 = vperm.slane %v60_v14, 0 }
  0x21   :  { %v69_v16 = vmul.f32 %v67_v15, %v65_v13 }
  0x23   :  { %70 = vst [vmem:[#allocation7] sm:$0xff] %v69_v16 }
  0x24   :  { %81 = dma.vmem_to_hbm [thread:$0]  %s77_s2, 128, %s79_s25, [#allocation4]  }
  0x25   :  { %171 = dma.done.wait [#allocation4], 128  }
  0x26   :  { %172 = vsyncadd [#allocation4], 4294967168 }
  0x27   :  { %86 = vsyncpa [#allocation3], 1 }
  0x28   :  { %87 = vsyncpa [#allocation6], 1 }
  0x29   :  { %88 = vsyncpa [#allocation4], 1 }

</bundles_post_ra>
